<compile_context>
chip_gen: v7x
topology: tpu7x:2x2x1
jax: 0.10.0
libtpu: 0.0.40
codegen_flags: <defaults>
</compile_context>

<pallas_src>
import jax
import jax.numpy as jnp
from jax.experimental import pallas as pl
from jax.experimental.pallas import tpu as pltpu


# ---------------------------------------------------------------------------
# Pallas kernel: fused multi-head attention for one batch chunk per grid step
# ---------------------------------------------------------------------------
def make_attention_kernel(bc, Lq, Skv, n_heads, head_dim):
    scale = float(head_dim) ** -0.5
    hd = head_dim
    bl = bc * Lq                       # query rows per chunk (per head block)

    def kernel(xq_ref, xk_ref, xv_ref, w_ref, b_ref, mask_ref, out_ref):
        xq = xq_ref[...]               # (bc*Lq,  D)
        xk = xk_ref[...]               # (bc*Skv, D)
        xv = xv_ref[...]               # (bc*Skv, D)

        wq, wk, wv, wo = w_ref[0], w_ref[1], w_ref[2], w_ref[3]   # (D, D) each
        bq = b_ref[0:1, :]             # (1, D)
        bk = b_ref[1:2, :]
        bv = b_ref[2:3, :]
        bo = b_ref[3:4, :]

        # Q/K/V projections: full-width MXU matmuls on the folded-batch slabs.
        q = jnp.dot(xq, wq, preferred_element_type=jnp.float32) + bq
        k = jnp.dot(xk, wk, preferred_element_type=jnp.float32) + bk
        v = jnp.dot(xv, wv, preferred_element_type=jnp.float32) + bv

        # Re-pack heads onto the sublane axis: rows ordered (head, batch, tok).
        # Static lane slices + sublane concatenates only (no transposes).
        qs = jnp.concatenate(
            [q[:, h * hd:(h + 1) * hd] for h in range(n_heads)], axis=0)
        ks = jnp.concatenate(
            [k[:, h * hd:(h + 1) * hd] for h in range(n_heads)], axis=0)
        vs = jnp.concatenate(
            [v[:, h * hd:(h + 1) * hd] for h in range(n_heads)], axis=0)

        # ONE fused score matmul for all heads / whole chunk; the additive
        # block-diagonal mask (0 on-diagonal, -1e30 off) confines attention to
        # its own (head, batch) block.
        s = jax.lax.dot_general(
            qs, ks, (((1,), (1,)), ((), ())),
            preferred_element_type=jnp.float32) * scale
        s = s + mask_ref[...]
        # TODO(synk): optional external attn_mask argument not supported
        # (attn_mask=None path only).

        # Numerically-stable softmax over the key axis.
        m = jnp.max(s, axis=-1, keepdims=True)
        p = jnp.exp(s - m)
        denom = jnp.sum(p, axis=-1, keepdims=True)
        p = p * pl.reciprocal(denom, approx=True)
        # TODO(synk): nn.Dropout on attention weights omitted (eval mode).

        # One fused P @ V matmul for all heads.
        o_s = jnp.dot(p, vs, preferred_element_type=jnp.float32)   # (H*bl, hd)

        # Back to (bc*Lq, D): lane-concat the per-head row blocks, then ONE
        # output-projection matmul against the full out_proj weight.
        o = jnp.concatenate(
            [o_s[h * bl:(h + 1) * bl, :] for h in range(n_heads)], axis=1)
        out_ref[...] = jnp.dot(o, wo, preferred_element_type=jnp.float32) + bo

    return kernel


# ---------------------------------------------------------------------------
# Wrapper: batch folding, weight packing, pallas_call
# ---------------------------------------------------------------------------
def _pick_batch_chunk(batch, rows_per_example, target_rows=128):
    """Largest divisor of `batch` whose fused score matrix stays ~128 rows."""
    best = 1
    for cand in range(1, batch + 1):
        if batch % cand == 0 and cand * rows_per_example <= target_rows:
            best = cand
    return best


def full_attention_forward(queries, keys, values, params, *, n_heads):
    """Pallas TPU forward for FullAttention (eval mode). Returns (out, None)."""
    B, Lq, D = queries.shape
    Bk, Skv, Dk = keys.shape
    assert (B, D) == (Bk, Dk) and values.shape == keys.shape
    assert D % n_heads == 0
    head_dim = D // n_heads

    # Fold batch onto sublanes; chunk so each grid step's fused score matrix
    # is ~one 128-row MXU tile.  Grid axis is fully parallel (v7x: 2 TCs).
    bc = _pick_batch_chunk(B, n_heads * max(Lq, Skv))
    n_chunks = B // bc

    xq = queries.reshape(B * Lq, D)
    xk = keys.reshape(B * Skv, D)
    xv = values.reshape(B * Skv, D)

    # Pack the 4 projection weights / biases into single refs.
    w_stack = jnp.stack([params["wqT"], params["wkT"],
                         params["wvT"], params["woT"]], axis=0)   # (4, D, D)
    b_stack = jnp.stack([params["bq"], params["bk"],
                         params["bv"], params["bo"]], axis=0)     # (4, D)

    # Structural block-diagonal additive mask (grid-invariant, built once in
    # plain XLA, reused by every grid step).
    n_blocks = n_heads * bc
    rg = jnp.arange(n_blocks * Lq, dtype=jnp.int32)[:, None] // Lq
    cg = jnp.arange(n_blocks * Skv, dtype=jnp.int32)[None, :] // Skv
    mask_add = jnp.where(rg == cg, 0.0, -1e30).astype(jnp.float32)

    kernel = make_attention_kernel(bc, Lq, Skv, n_heads, head_dim)

    in_specs = [
        pl.BlockSpec((bc * Lq, D), lambda i: (i, 0)),
        pl.BlockSpec((bc * Skv, D), lambda i: (i, 0)),
        pl.BlockSpec((bc * Skv, D), lambda i: (i, 0)),
        pl.BlockSpec((4, D, D), lambda i: (0, 0, 0)),
        pl.BlockSpec((4, D), lambda i: (0, 0)),
        pl.BlockSpec((n_blocks * Lq, n_blocks * Skv), lambda i: (0, 0)),
    ]
    out_spec = pl.BlockSpec((bc * Lq, D), lambda i: (i, 0))

    out = pl.pallas_call(
        kernel,
        out_shape=jax.ShapeDtypeStruct((B * Lq, D), jnp.float32),
        grid_spec=pltpu.PrefetchScalarGridSpec(
            num_scalar_prefetch=0,
            grid=(n_chunks,),
            in_specs=in_specs,
            out_specs=out_spec,
        ),
        compiler_params=pltpu.CompilerParams(
            dimension_semantics=("parallel",)),
    )(xq, xk, xv, w_stack, b_stack, mask_add)

    # output_attention=False path: attention weights are not returned.
    return out.reshape(B, Lq, D), None


# ---------------------------------------------------------------------------
# Deterministic parameter init (shapes follow nn.Linear(d_model, d_model))
# ---------------------------------------------------------------------------
def init_params(key, d_model):
    ks = jax.random.split(key, 8)
    wscale = d_model ** -0.5

    def w(k):
        return jax.random.normal(k, (d_model, d_model), jnp.float32) * wscale

    def b(k):
        return jax.random.normal(k, (d_model,), jnp.float32) * 0.1

    return {"wqT": w(ks[0]), "bq": b(ks[1]),
            "wkT": w(ks[2]), "bk": b(ks[3]),
            "wvT": w(ks[4]), "bv": b(ks[5]),
            "woT": w(ks[6]), "bo": b(ks[7])}


# ---------------------------------------------------------------------------
# Plain-JAX reference (mirrors the PyTorch module, for a sanity check only)
# ---------------------------------------------------------------------------
def reference_full_attention(q, k, v, params, *, n_heads):
    B, L, D = q.shape
    _, S, _ = k.shape
    hd = D // n_heads
    scale = hd ** -0.5

    Q = q @ params["wqT"] + params["bq"]
    K = k @ params["wkT"] + params["bk"]
    V = v @ params["wvT"] + params["bv"]

    def split(t, T):
        return t.reshape(B, T, n_heads, hd).transpose(0, 2, 1, 3)

    Qh, Kh, Vh = split(Q, L), split(K, S), split(V, S)
    s = jnp.einsum("bhld,bhsd->bhls", Qh, Kh) * scale
    p = jax.nn.softmax(s, axis=-1)
    o = jnp.einsum("bhls,bhsd->bhld", p, Vh)
    o = o.transpose(0, 2, 1, 3).reshape(B, L, D)
    return o @ params["woT"] + params["bo"]


# ---------------------------------------------------------------------------
if __name__ == "__main__":
    # FullAttention(d_model=32, n_heads=8) on [batch=2, seq=8, d_model=32]
    B, L, D, H = 2, 8, 32, 8

    key = jax.random.PRNGKey(0)
    kx, kp = jax.random.split(key)
    x = jax.random.normal(kx, (B, L, D), jnp.float32)
    params = init_params(kp, D)

    out, attn = full_attention_forward(x, x, x, params, n_heads=H)
    out = jax.block_until_ready(out)

    ref = reference_full_attention(x, x, x, params, n_heads=H)

    assert out.shape == (B, L, D), out.shape
    assert attn is None
    assert jnp.allclose(out, ref, atol=2e-2, rtol=2e-2), \
        float(jnp.max(jnp.abs(out - ref)))

    print("KERNEL_OK")
</pallas_src>

<mosaic_0001>
module attributes {stable_mosaic.version = 11 : i64} {
  func.func @kernel(%arg0: i32, %arg1: memref<16x32xf32, #tpu.memory_space<vmem>>, %arg2: memref<16x32xf32, #tpu.memory_space<vmem>>, %arg3: memref<16x32xf32, #tpu.memory_space<vmem>>, %arg4: memref<4x32x32xf32, #tpu.memory_space<vmem>>, %arg5: memref<4x32xf32, #tpu.memory_space<vmem>>, %arg6: memref<128x128xf32, #tpu.memory_space<vmem>>, %arg7: memref<16x32xf32, #tpu.memory_space<vmem>>) attributes {dimension_semantics = [#tpu.dimension_semantics<parallel>], iteration_bounds = array<i64: 1>, scalar_prefetch = 0 : i64, scratch_operands = 0 : i64, tpu.core_type = #tpu.core_type<tc>, window_params = [{transform_indices = @transform_0, window_bounds = array<i64: 16, 32>}, {transform_indices = @transform_1, window_bounds = array<i64: 16, 32>}, {transform_indices = @transform_2, window_bounds = array<i64: 16, 32>}, {pipeline_mode = #tpu.pipeline_mode<synchronous>, transform_indices = @transform_3, window_bounds = array<i64: 4, 32, 32>}, {pipeline_mode = #tpu.pipeline_mode<synchronous>, transform_indices = @transform_4, window_bounds = array<i64: 4, 32>}, {pipeline_mode = #tpu.pipeline_mode<synchronous>, transform_indices = @transform_5, window_bounds = array<i64: 128, 128>}, {transform_indices = @transform_6, window_bounds = array<i64: 16, 32>}]} {
    %c0 = arith.constant 0 : index
    %c0_0 = arith.constant 0 : index
    %0 = vector.load %arg1[%c0, %c0_0] : memref<16x32xf32, #tpu.memory_space<vmem>>, vector<16x32xf32>
    %c0_1 = arith.constant 0 : index
    %c0_2 = arith.constant 0 : index
    %1 = vector.load %arg2[%c0_1, %c0_2] : memref<16x32xf32, #tpu.memory_space<vmem>>, vector<16x32xf32>
    %c0_3 = arith.constant 0 : index
    %c0_4 = arith.constant 0 : index
    %2 = vector.load %arg3[%c0_3, %c0_4] : memref<16x32xf32, #tpu.memory_space<vmem>>, vector<16x32xf32>
    %c0_5 = arith.constant 0 : index
    %c0_6 = arith.constant 0 : index
    %c0_7 = arith.constant 0 : index
    %3 = vector.load %arg4[%c0_5, %c0_6, %c0_7] : memref<4x32x32xf32, #tpu.memory_space<vmem>>, vector<1x32x32xf32>
    %4 = vector.shape_cast %3 : vector<1x32x32xf32> to vector<32x32xf32>
    %c1 = arith.constant 1 : index
    %c0_8 = arith.constant 0 : index
    %c0_9 = arith.constant 0 : index
    %5 = vector.load %arg4[%c1, %c0_8, %c0_9] : memref<4x32x32xf32, #tpu.memory_space<vmem>>, vector<1x32x32xf32>
    %6 = vector.shape_cast %5 : vector<1x32x32xf32> to vector<32x32xf32>
    %c2 = arith.constant 2 : index
    %c0_10 = arith.constant 0 : index
    %c0_11 = arith.constant 0 : index
    %7 = vector.load %arg4[%c2, %c0_10, %c0_11] : memref<4x32x32xf32, #tpu.memory_space<vmem>>, vector<1x32x32xf32>
    %8 = vector.shape_cast %7 : vector<1x32x32xf32> to vector<32x32xf32>
    %c3 = arith.constant 3 : index
    %c0_12 = arith.constant 0 : index
    %c0_13 = arith.constant 0 : index
    %9 = vector.load %arg4[%c3, %c0_12, %c0_13] : memref<4x32x32xf32, #tpu.memory_space<vmem>>, vector<1x32x32xf32>
    %10 = vector.shape_cast %9 : vector<1x32x32xf32> to vector<32x32xf32>
    %c0_14 = arith.constant 0 : index
    %c0_15 = arith.constant 0 : index
    %11 = vector.load %arg5[%c0_14, %c0_15] : memref<4x32xf32, #tpu.memory_space<vmem>>, vector<1x32xf32>
    %c1_16 = arith.constant 1 : index
    %c0_17 = arith.constant 0 : index
    %12 = vector.load %arg5[%c1_16, %c0_17] : memref<4x32xf32, #tpu.memory_space<vmem>>, vector<1x32xf32>
    %c2_18 = arith.constant 2 : index
    %c0_19 = arith.constant 0 : index
    %13 = vector.load %arg5[%c2_18, %c0_19] : memref<4x32xf32, #tpu.memory_space<vmem>>, vector<1x32xf32>
    %c3_20 = arith.constant 3 : index
    %c0_21 = arith.constant 0 : index
    %14 = vector.load %arg5[%c3_20, %c0_21] : memref<4x32xf32, #tpu.memory_space<vmem>>, vector<1x32xf32>
    %cst = arith.constant dense<0.000000e+00> : vector<16x32xf32>
    %15 = tpu.matmul %0, %4, %cst {dimension_numbers = #tpu.dot_dimension_numbers<[1], [0], [0], [1], [0, 0, 1, 1], [], []>} : vector<16x32xf32>, vector<32x32xf32>, vector<16x32xf32> -> vector<16x32xf32>
    %16 = vector.broadcast %11 : vector<1x32xf32> to vector<16x32xf32>
    %17 = arith.addf %15, %16 : vector<16x32xf32>
    %cst_22 = arith.constant dense<0.000000e+00> : vector<16x32xf32>
    %18 = tpu.matmul %1, %6, %cst_22 {dimension_numbers = #tpu.dot_dimension_numbers<[1], [0], [0], [1], [0, 0, 1, 1], [], []>} : vector<16x32xf32>, vector<32x32xf32>, vector<16x32xf32> -> vector<16x32xf32>
    %19 = vector.broadcast %12 : vector<1x32xf32> to vector<16x32xf32>
    %20 = arith.addf %18, %19 : vector<16x32xf32>
    %cst_23 = arith.constant dense<0.000000e+00> : vector<16x32xf32>
    %21 = tpu.matmul %2, %8, %cst_23 {dimension_numbers = #tpu.dot_dimension_numbers<[1], [0], [0], [1], [0, 0, 1, 1], [], []>} : vector<16x32xf32>, vector<32x32xf32>, vector<16x32xf32> -> vector<16x32xf32>
    %22 = vector.broadcast %13 : vector<1x32xf32> to vector<16x32xf32>
    %23 = arith.addf %21, %22 : vector<16x32xf32>
    %24 = vector.extract_strided_slice %17 {offsets = [0, 0], sizes = [16, 4], strides = [1, 1]} : vector<16x32xf32> to vector<16x4xf32>
    %25 = vector.extract_strided_slice %17 {offsets = [0, 4], sizes = [16, 4], strides = [1, 1]} : vector<16x32xf32> to vector<16x4xf32>
    %26 = vector.extract_strided_slice %17 {offsets = [0, 8], sizes = [16, 4], strides = [1, 1]} : vector<16x32xf32> to vector<16x4xf32>
    %27 = vector.extract_strided_slice %17 {offsets = [0, 12], sizes = [16, 4], strides = [1, 1]} : vector<16x32xf32> to vector<16x4xf32>
    %28 = vector.extract_strided_slice %17 {offsets = [0, 16], sizes = [16, 4], strides = [1, 1]} : vector<16x32xf32> to vector<16x4xf32>
    %29 = vector.extract_strided_slice %17 {offsets = [0, 20], sizes = [16, 4], strides = [1, 1]} : vector<16x32xf32> to vector<16x4xf32>
    %30 = vector.extract_strided_slice %17 {offsets = [0, 24], sizes = [16, 4], strides = [1, 1]} : vector<16x32xf32> to vector<16x4xf32>
    %31 = vector.extract_strided_slice %17 {offsets = [0, 28], sizes = [16, 4], strides = [1, 1]} : vector<16x32xf32> to vector<16x4xf32>
    %32 = tpu.concatenate %24, %25, %26, %27, %28, %29, %30, %31 in 0 : vector<16x4xf32>, vector<16x4xf32>, vector<16x4xf32>, vector<16x4xf32>, vector<16x4xf32>, vector<16x4xf32>, vector<16x4xf32>, vector<16x4xf32> -> vector<128x4xf32>
    %33 = vector.extract_strided_slice %20 {offsets = [0, 0], sizes = [16, 4], strides = [1, 1]} : vector<16x32xf32> to vector<16x4xf32>
    %34 = vector.extract_strided_slice %20 {offsets = [0, 4], sizes = [16, 4], strides = [1, 1]} : vector<16x32xf32> to vector<16x4xf32>
    %35 = vector.extract_strided_slice %20 {offsets = [0, 8], sizes = [16, 4], strides = [1, 1]} : vector<16x32xf32> to vector<16x4xf32>
    %36 = vector.extract_strided_slice %20 {offsets = [0, 12], sizes = [16, 4], strides = [1, 1]} : vector<16x32xf32> to vector<16x4xf32>
    %37 = vector.extract_strided_slice %20 {offsets = [0, 16], sizes = [16, 4], strides = [1, 1]} : vector<16x32xf32> to vector<16x4xf32>
    %38 = vector.extract_strided_slice %20 {offsets = [0, 20], sizes = [16, 4], strides = [1, 1]} : vector<16x32xf32> to vector<16x4xf32>
    %39 = vector.extract_strided_slice %20 {offsets = [0, 24], sizes = [16, 4], strides = [1, 1]} : vector<16x32xf32> to vector<16x4xf32>
    %40 = vector.extract_strided_slice %20 {offsets = [0, 28], sizes = [16, 4], strides = [1, 1]} : vector<16x32xf32> to vector<16x4xf32>
    %41 = tpu.concatenate %33, %34, %35, %36, %37, %38, %39, %40 in 0 : vector<16x4xf32>, vector<16x4xf32>, vector<16x4xf32>, vector<16x4xf32>, vector<16x4xf32>, vector<16x4xf32>, vector<16x4xf32>, vector<16x4xf32> -> vector<128x4xf32>
    %42 = vector.extract_strided_slice %23 {offsets = [0, 0], sizes = [16, 4], strides = [1, 1]} : vector<16x32xf32> to vector<16x4xf32>
    %43 = vector.extract_strided_slice %23 {offsets = [0, 4], sizes = [16, 4], strides = [1, 1]} : vector<16x32xf32> to vector<16x4xf32>
    %44 = vector.extract_strided_slice %23 {offsets = [0, 8], sizes = [16, 4], strides = [1, 1]} : vector<16x32xf32> to vector<16x4xf32>
    %45 = vector.extract_strided_slice %23 {offsets = [0, 12], sizes = [16, 4], strides = [1, 1]} : vector<16x32xf32> to vector<16x4xf32>
    %46 = vector.extract_strided_slice %23 {offsets = [0, 16], sizes = [16, 4], strides = [1, 1]} : vector<16x32xf32> to vector<16x4xf32>
    %47 = vector.extract_strided_slice %23 {offsets = [0, 20], sizes = [16, 4], strides = [1, 1]} : vector<16x32xf32> to vector<16x4xf32>
    %48 = vector.extract_strided_slice %23 {offsets = [0, 24], sizes = [16, 4], strides = [1, 1]} : vector<16x32xf32> to vector<16x4xf32>
    %49 = vector.extract_strided_slice %23 {offsets = [0, 28], sizes = [16, 4], strides = [1, 1]} : vector<16x32xf32> to vector<16x4xf32>
    %50 = tpu.concatenate %42, %43, %44, %45, %46, %47, %48, %49 in 0 : vector<16x4xf32>, vector<16x4xf32>, vector<16x4xf32>, vector<16x4xf32>, vector<16x4xf32>, vector<16x4xf32>, vector<16x4xf32>, vector<16x4xf32> -> vector<128x4xf32>
    %cst_24 = arith.constant dense<0.000000e+00> : vector<128x128xf32>
    %51 = tpu.matmul %32, %41, %cst_24 {dimension_numbers = #tpu.dot_dimension_numbers<[1], [1], [0], [0], [0, 0, 1, 0], [], []>} : vector<128x4xf32>, vector<128x4xf32>, vector<128x128xf32> -> vector<128x128xf32>
    %cst_25 = arith.constant 5.000000e-01 : f32
    %52 = vector.broadcast %cst_25 : f32 to vector<128x128xf32>
    %53 = arith.mulf %51, %52 : vector<128x128xf32>
    %c0_26 = arith.constant 0 : index
    %c0_27 = arith.constant 0 : index
    %54 = vector.load %arg6[%c0_26, %c0_27] : memref<128x128xf32, #tpu.memory_space<vmem>>, vector<128x128xf32>
    %55 = arith.addf %53, %54 : vector<128x128xf32>
    %cst_28 = arith.constant dense<0xFF800000> : vector<128xf32>
    %56 = vector.multi_reduction <maximumf>, %55, %cst_28 [1] : vector<128x128xf32> to vector<128xf32>
    %57 = vector.shape_cast %56 : vector<128xf32> to vector<128x1xf32>
    %58 = vector.broadcast %57 : vector<128x1xf32> to vector<128x128xf32>
    %59 = arith.subf %55, %58 : vector<128x128xf32>
    %60 = math.exp %59 : vector<128x128xf32>
    %cst_29 = arith.constant dense<0.000000e+00> : vector<128xf32>
    %61 = vector.multi_reduction <add>, %60, %cst_29 [1] : vector<128x128xf32> to vector<128xf32>
    %62 = vector.shape_cast %61 : vector<128xf32> to vector<128x1xf32>
    %63 = tpu.reciprocal %62 {approx = true} : vector<128x1xf32> -> vector<128x1xf32>
    %64 = vector.broadcast %63 : vector<128x1xf32> to vector<128x128xf32>
    %65 = arith.mulf %60, %64 : vector<128x128xf32>
    %cst_30 = arith.constant dense<0.000000e+00> : vector<128x4xf32>
    %66 = tpu.matmul %65, %50, %cst_30 {dimension_numbers = #tpu.dot_dimension_numbers<[1], [0], [0], [1], [0, 0, 1, 1], [], []>} : vector<128x128xf32>, vector<128x4xf32>, vector<128x4xf32> -> vector<128x4xf32>
    %67 = vector.extract_strided_slice %66 {offsets = [0, 0], sizes = [16, 4], strides = [1, 1]} : vector<128x4xf32> to vector<16x4xf32>
    %68 = vector.extract_strided_slice %66 {offsets = [16, 0], sizes = [16, 4], strides = [1, 1]} : vector<128x4xf32> to vector<16x4xf32>
    %69 = vector.extract_strided_slice %66 {offsets = [32, 0], sizes = [16, 4], strides = [1, 1]} : vector<128x4xf32> to vector<16x4xf32>
    %70 = vector.extract_strided_slice %66 {offsets = [48, 0], sizes = [16, 4], strides = [1, 1]} : vector<128x4xf32> to vector<16x4xf32>
    %71 = vector.extract_strided_slice %66 {offsets = [64, 0], sizes = [16, 4], strides = [1, 1]} : vector<128x4xf32> to vector<16x4xf32>
    %72 = vector.extract_strided_slice %66 {offsets = [80, 0], sizes = [16, 4], strides = [1, 1]} : vector<128x4xf32> to vector<16x4xf32>
    %73 = vector.extract_strided_slice %66 {offsets = [96, 0], sizes = [16, 4], strides = [1, 1]} : vector<128x4xf32> to vector<16x4xf32>
    %74 = vector.extract_strided_slice %66 {offsets = [112, 0], sizes = [16, 4], strides = [1, 1]} : vector<128x4xf32> to vector<16x4xf32>
    %75 = tpu.concatenate %67, %68, %69, %70, %71, %72, %73, %74 in 1 : vector<16x4xf32>, vector<16x4xf32>, vector<16x4xf32>, vector<16x4xf32>, vector<16x4xf32>, vector<16x4xf32>, vector<16x4xf32>, vector<16x4xf32> -> vector<16x32xf32>
    %cst_31 = arith.constant dense<0.000000e+00> : vector<16x32xf32>
    %76 = tpu.matmul %75, %10, %cst_31 {dimension_numbers = #tpu.dot_dimension_numbers<[1], [0], [0], [1], [0, 0, 1, 1], [], []>} : vector<16x32xf32>, vector<32x32xf32>, vector<16x32xf32> -> vector<16x32xf32>
    %77 = vector.broadcast %14 : vector<1x32xf32> to vector<16x32xf32>
    %78 = arith.addf %76, %77 : vector<16x32xf32>
    %c0_32 = arith.constant 0 : index
    %c0_33 = arith.constant 0 : index
    %79 = vector.load %arg7[%c0_32, %c0_33] : memref<16x32xf32, #tpu.memory_space<vmem>>, vector<16x32xf32>
    tpu.vector_store %arg7[%c0_32, %c0_33], %78 {strides = array<i32>} : memref<16x32xf32, #tpu.memory_space<vmem>>, vector<16x32xf32>,
    return
  }
  func.func @transform_0(%arg0: i32) -> (i32, i32) {
    %c0_i32 = arith.constant 0 : i32
    %c0_i32_0 = arith.constant 0 : i32
    return %arg0, %c0_i32 : i32, i32
  }
  func.func @transform_1(%arg0: i32) -> (i32, i32) {
    %c0_i32 = arith.constant 0 : i32
    %c0_i32_0 = arith.constant 0 : i32
    return %arg0, %c0_i32 : i32, i32
  }
  func.func @transform_2(%arg0: i32) -> (i32, i32) {
    %c0_i32 = arith.constant 0 : i32
    %c0_i32_0 = arith.constant 0 : i32
    return %arg0, %c0_i32 : i32, i32
  }
  func.func @transform_3(%arg0: i32) -> (i32, i32, i32) {
    %c0_i32 = arith.constant 0 : i32
    %c0_i32_0 = arith.constant 0 : i32
    %c0_i32_1 = arith.constant 0 : i32
    %c0_i32_2 = arith.constant 0 : i32
    return %c0_i32, %c0_i32_0, %c0_i32_1 : i32, i32, i32
  }
  func.func @transform_4(%arg0: i32) -> (i32, i32) {
    %c0_i32 = arith.constant 0 : i32
    %c0_i32_0 = arith.constant 0 : i32
    %c0_i32_1 = arith.constant 0 : i32
    return %c0_i32, %c0_i32_0 : i32, i32
  }
  func.func @transform_5(%arg0: i32) -> (i32, i32) {
    %c0_i32 = arith.constant 0 : i32
    %c0_i32_0 = arith.constant 0 : i32
    %c0_i32_1 = arith.constant 0 : i32
    return %c0_i32, %c0_i32_0 : i32, i32
  }
  func.func @transform_6(%arg0: i32) -> (i32, i32) {
    %c0_i32 = arith.constant 0 : i32
    %c0_i32_0 = arith.constant 0 : i32
    return %arg0, %c0_i32 : i32, i32
  }
}

</mosaic_0001>

<bundles_post_ra>
// kernel: tpu_custom_call.1
= control target key start
LH: loop header
LB: loop body
LE: loop exit
PB: predicated region body
PF: predicated region fallthrough
CT: control target
= control target key end

     0   :  { %11 = vsyncpa [#allocation3], 0  ;;  %s2310_s0 = inlined_call_operand.hbm [shape: f32[16,32], index: 0, kind: input, shape index: {}]   ;;  %s2311_s1 = inlined_call_operand.hbm [shape: f32[16,32], index: 1, kind: input, shape index: {}]   ;;  %s2312_s2 = inlined_call_operand.hbm [shape: f32[16,32], index: 2, kind: input, shape index: {}]   ;;  %s2313_s3 = inlined_call_operand.hbm [shape: f32[4,32,32], index: 3, kind: input, shape index: {}]   ;;  %s2314_s4 = inlined_call_operand.vmem [shape: f32[4,32], index: 4, kind: input, shape index: {}]   ;;  %s2315_s5 = inlined_call_operand.hbm [shape: f32[128,128], index: 5, kind: input, shape index: {}]   ;;  %s2316_s6 = inlined_call_operand.hbm [shape: f32[16,32], index: 6, kind: output, shape index: {}]  }
   0x1   :  { %12 = vsyncpa [#allocation6], 0 }
   0x2   :  { %13 = vsyncpa [#allocation9], 0 }
   0x3   :  { %14 = vsyncpa [#allocation4], 0  ;;  %s1905_s21 = smov [#allocation5]   ;;  %s1906_s23 = smov [#allocation8]  }
   0x4   :  { %s32_s22 = sshll.u32 %s1905_s21, 4  ;;  %s56_s24 = sshll.u32 %s1906_s23, 4  ;;  %s33_s22 = int_to_ptr.vmem [resolvable:$true] %s32_s22  ;;  %s1961_s24 = int_to_ptr.vmem [resolvable:$true] %s56_s24 }
   0x5   :  { %s1765_s27 = scalar_lea.hbm %s2311_s1, 256 }
   0x6   :  { %p1766_p0 = scmp.ne.s32.totalorder %s2311_s1, %s1765_s27  ;;  %p1769_p1 = scmp.lt.u32.totalorder %s1765_s27, %s2311_s1 }
   0x8   :  { %p1771_p2 = pnand %p1769_p1, %p1766_p0 }
   0xa   :  { %1774 = shalt.err (!%p1771_p2)
}
   0xb   :  { %s1775_s8 = scalar_lea.vmem %s33_s22, 256  ;;  %p1780_p4 = scmp.lt.s32.totalorder %s33_s22, %s33_s22 }
   0xc   :  { %p1776_p3 = scmp.ne.s32.totalorder %s33_s22, %s1775_s8  ;;  %p1781_p5 = scmp.lt.s32.totalorder %s1775_s8, %s1775_s8 }
   0xe   :  { %p1782_p6 = por %p1781_p5, %p1780_p4 }
  0x10   :  { %p1783_p7 = pnand %p1782_p6, %p1776_p3 }
  0x12   :  { %1786 = shalt.err (!%p1783_p7)
}
  0x13   :  { %s1907_s9 = smov 128   ;;  %s1908_s10 = smov 8  }
  0x14   :  { %38 = dma.hbm_to_vmem [thread:$0]  %s2311_s1, 256, %s33_s22, [#allocation6], %s1907_s9, %s1907_s9, %s1908_s10  }
  0x15   :  { %s1787_s15 = scalar_lea.hbm %s2313_s3, 2048 }
  0x16   :  { %p1788_p8 = scmp.ne.s32.totalorder %s2313_s3, %s1787_s15  ;;  %p1791_p9 = scmp.lt.u32.totalorder %s1787_s15, %s2313_s3 }
  0x18   :  { %p1793_p10 = pnand %p1791_p9, %p1788_p8 }
  0x1a   :  { %1796 = shalt.err (!%p1793_p10)
}
  0x1b   :  { %s1797_s20 = scalar_lea.vmem %s1961_s24, 2048  ;;  %p1802_p12 = scmp.lt.s32.totalorder %s1961_s24, %s1961_s24 }
  0x1c   :  { %p1798_p11 = scmp.ne.s32.totalorder %s1961_s24, %s1797_s20  ;;  %p1803_p13 = scmp.lt.s32.totalorder %s1797_s20, %s1797_s20 }
  0x1e   :  { %p1804_p0 = por %p1803_p13, %p1802_p12 }
  0x20   :  { %p1805_p1 = pnand %p1804_p0, %p1798_p11 }
  0x22   :  { %1808 = shalt.err (!%p1805_p1)
}
  0x23   :  { %62 = dma.hbm_to_vmem [thread:$0]  %s2313_s3, 2048, %s1961_s24, [#allocation9], %s1907_s9, %s1907_s9, %s1908_s10  }
  0x24   :  { %s1909_s22 = smov [#allocation2]   ;;  %s1910_s25 = smov [#allocation7]  }
  0x25   :  { %s20_s23 = sshll.u32 %s1909_s22, 4  ;;  %s44_s26 = sshll.u32 %s1910_s25, 4  ;;  %s21_s23 = int_to_ptr.vmem [resolvable:$true] %s20_s23  ;;  %s1998_s26 = int_to_ptr.vmem [resolvable:$true] %s44_s26 }
  0x26   :  { %s1809_s29 = scalar_lea.hbm %s2310_s0, 256 }
  0x27   :  { %p1810_p2 = scmp.ne.s32.totalorder %s2310_s0, %s1809_s29  ;;  %p1813_p3 = scmp.lt.u32.totalorder %s1809_s29, %s2310_s0 }
  0x29   :  { %p1815_p4 = pnand %p1813_p3, %p1810_p2 }
  0x2b   :  { %1818 = shalt.err (!%p1815_p4)
}
  0x2c   :  { %s1819_s3 = scalar_lea.vmem %s21_s23, 256  ;;  %p1824_p6 = scmp.lt.s32.totalorder %s21_s23, %s21_s23 }
  0x2d   :  { %p1820_p5 = scmp.ne.s32.totalorder %s21_s23, %s1819_s3  ;;  %p1825_p7 = scmp.lt.s32.totalorder %s1819_s3, %s1819_s3 }
  0x2f   :  { %p1826_p8 = por %p1825_p7, %p1824_p6 }
  0x31   :  { %p1827_p9 = pnand %p1826_p8, %p1820_p5 }
  0x33   :  { %1830 = shalt.err (!%p1827_p9)
}
  0x34   :  { %26 = dma.hbm_to_vmem [thread:$0]  %s2310_s0, 256, %s21_s23, [#allocation3], %s1907_s9, %s1907_s9, %s1908_s10  }
  0x35   :  { %s1831_s15 = scalar_lea.hbm %s2312_s2, 256 }
  0x36   :  { %p1832_p10 = scmp.ne.s32.totalorder %s2312_s2, %s1831_s15  ;;  %p1835_p11 = scmp.lt.u32.totalorder %s1831_s15, %s2312_s2 }
  0x38   :  { %p1837_p12 = pnand %p1835_p11, %p1832_p10 }
  0x3a   :  { %1840 = shalt.err (!%p1837_p12)
}
  0x3b   :  { %s1841_s20 = scalar_lea.vmem %s1998_s26, 256  ;;  %p1846_p0 = scmp.lt.s32.totalorder %s1998_s26, %s1998_s26 }
  0x3c   :  { %p1842_p13 = scmp.ne.s32.totalorder %s1998_s26, %s1841_s20  ;;  %p1847_p1 = scmp.lt.s32.totalorder %s1841_s20, %s1841_s20 }
  0x3e   :  { %p1848_p2 = por %p1847_p1, %p1846_p0 }
  0x40   :  { %p1849_p3 = pnand %p1848_p2, %p1842_p13 }
  0x42   :  { %1852 = shalt.err (!%p1849_p3)
}
  0x43   :  { %50 = dma.hbm_to_vmem [thread:$0]  %s2312_s2, 256, %s1998_s26, [#allocation6], %s1907_s9, %s1907_s9, %s1908_s10  }
  0x44   :  { %s1911_s21 = smov [#allocation10]   ;;  %s1853_s27 = scalar_lea.hbm %s2315_s5, 2048 }
  0x45   :  { %s70_s22 = sshll.u32 %s1911_s21, 4  ;;  %p1854_p4 = scmp.ne.s32.totalorder %s2315_s5, %s1853_s27  ;;  %s71_s22 = int_to_ptr.vmem [resolvable:$true] %s70_s22 }
  0x46   :  { %p1857_p5 = scmp.lt.u32.totalorder %s1853_s27, %s2315_s5 }
  0x48   :  { %p1859_p6 = pnand %p1857_p5, %p1854_p4 }
  0x4a   :  { %1862 = shalt.err (!%p1859_p6)
}
  0x4b   :  { %s1863_s8 = scalar_lea.vmem %s71_s22, 2048  ;;  %p1868_p8 = scmp.lt.s32.totalorder %s71_s22, %s71_s22 }
  0x4c   :  { %p1864_p7 = scmp.ne.s32.totalorder %s71_s22, %s1863_s8  ;;  %p1869_p9 = scmp.lt.s32.totalorder %s1863_s8, %s1863_s8 }
  0x4e   :  { %p1870_p10 = por %p1869_p9, %p1868_p8 }
  0x50   :  { %p1871_p11 = pnand %p1870_p10, %p1864_p7 }
  0x52   :  { %1874 = shalt.err (!%p1871_p11)
}
  0x53   :  { %76 = dma.hbm_to_vmem [thread:$0]  %s2315_s5, 2048, %s71_s22, [#allocation9], %s1907_s9, %s1907_s9, %s1908_s10  }
  0x54   :  { %1897 = dma.done.wait [#allocation3], 256  }
  0x55   :  { %1898 = vsyncadd [#allocation3], 4294967040 }
  0x56   :  { %1899 = dma.done.wait [#allocation6], 512  }
  0x57   :  { %1900 = vsyncadd [#allocation6], 4294966784 }
  0x58   :  { %1901 = dma.done.wait [#allocation9], 4096  }
  0x59   :  { %1902 = vsyncadd [#allocation9], 4294963200  ;;  %vm125_vm0 = vcmask 261120   ;;  %v98_v0 = vld [vmem:[#allocation8] sm:$0xff]  ;;  %v99_v1 = vld [vmem:[#allocation8 + $0x8] sm:$0xff]  ;;  %vm481_vm1 = vcmask 31744  }
  0x5a   :  { %v100_v2 = vld [vmem:[#allocation8 + $0x10] sm:$0xff]  ;;  %v1498_v3 = vpack.c.bf16 %v99_v1, %v98_v0  ;;  %v101_v4 = vld [vmem:[#allocation8 + $0x18] sm:$0xff]  ;;  %v103_v7 = vld [vmem:[#allocation8 + $0x20] sm:$0xff]  ;;  %s1912_s12 = smov 116   ;;  %s1913_s13 = smov 124   ;;  %vm1086_vm3 = vcmask 64512  }
  0x5b   :  { %v92_v5 = vld [vmem:[#allocation2] sm:$0xff]  ;;  %v1502_v6 = vpack.c.bf16 %v101_v4, %v100_v2  ;;  %v104_v8 = vld [vmem:[#allocation8 + $0x28] sm:$0xff]  ;;  %v106_v11 = vld [vmem:[#allocation8 + $0x38] sm:$0xff]  ;;  %s1914_s14 = smov 112   ;;  %s1915_s15 = smov 120   ;;  %vm1089_vm4 = vcmask 97280  }
  0x5c   :  { %1350 = vmatprep.mubr.msk.f32.mxu0 %vm125_vm0, %v92_v5  ;;  %1499 = vmatprep.subr.bf16.mxu0 %v1498_v3  ;;  %v1506_v9 = vpack.c.bf16 %v104_v8, %v103_v7  ;;  %v105_v10 = vld [vmem:[#allocation8 + $0x30] sm:$0xff]  ;;  %v93_v12 = vld [vmem:[#allocation2 + $0x8] sm:$0xff]  ;;  %v94_v14 = vld [vmem:[#allocation5] sm:$0xff]  ;;  %s1916_s16 = smov 104   ;;  %s1917_s17 = smov 108   ;;  %vm1092_vm5 = vcmask 130048  }
  0x5d   :  { %1501 = vmatpush3.bf16.msra.mxu0 %v1498_v3  ;;  %v1510_v13 = vpack.c.bf16 %v106_v11, %v105_v10  ;;  %v95_v15 = vld [vmem:[#allocation5 + $0x8] sm:$0xff]  ;;  %v1210_v16 = vld [vmem:[%s2314_s4] ss:$0 sm:$0xff]  ;;  %v108_v18 = vld [vmem:[#allocation8 + $0x40] sm:$0xff]  ;;  %s1918_s18 = smov 100   ;;  %s1919_s0 = smov 4  }
  0x5e   :  { %1503 = vmatprep.subr.bf16.mxu0 %v1502_v6  ;;  %v109_v19 = vld [vmem:[#allocation8 + $0x48] sm:$0xff]  ;;  %v110_v23 = vld [vmem:[#allocation8 + $0x50] sm:$0xff]  ;;  %v111_v24 = vld [vmem:[#allocation8 + $0x58] sm:$0xff]  ;;  %s1920_s1 = smov 12   ;;  %s1921_s21 = smov 16   ;;  %vm1095_vm6 = vcmask 162816  }
  0x5f   :  { %v1514_v21 = vpack.c.bf16 %v109_v19, %v108_v18  ;;  %v1518_v25 = vpack.c.bf16 %v111_v24, %v110_v23  ;;  %v1213_v26 = vld [vmem:[%s2314_s4 + $0x1] ss:$0 sm:$0xff]  ;;  %v97_v32 = vld [vmem:[#allocation7 + $0x8] sm:$0xff]  ;;  %vm2065_vm2 = vmpackc.low %vm481_vm1, %vm481_vm1  ;;  %s1922_s22 = smov 20   ;;  %s1923_s23 = smov 24   ;;  %vm1098_vm7 = vcmask 195584  }
  0x60   :  { %v96_v30 = vld [vmem:[#allocation7] sm:$0xff]  ;;  %s1924_s25 = smov 28   ;;  %vm1101_vm8 = vcmask 228352   ;;  %s1925_s29 = smov [#allocation11]  }
  0x61   :  { %1505 = vmatpush3.bf16.msra.mxu0 %v1502_v6  ;;  %s1196_s30 = sshll.u32 %s1925_s29, 4  ;;  %s1197_s30 = int_to_ptr.vmem [resolvable:$true] %s1196_s30 }
  0x62   :  { %1507 = vmatprep.subr.bf16.mxu0 %v1506_v9  ;;  %s1875_s7 = scalar_lea.vmem %s1197_s30, 256  ;;  %p1880_p13 = scmp.lt.s32.totalorder %s1197_s30, %s1197_s30 }
  0x63   :  { %p1876_p12 = scmp.ne.s32.totalorder %s1197_s30, %s1875_s7  ;;  %p1881_p0 = scmp.lt.s32.totalorder %s1875_s7, %s1875_s7 }
  0x64   :  { %1351 = vmatmul.mubr.msk.f32.vlgmr.msra.gmra.mrb[0].mxu0 %vm125_vm0, %v93_v12 }
  0x65   :  { %1509 = vmatpush3.bf16.msra.mxu0 %v1506_v9  ;;  %1361 = vmatprep.mubr.msk.f32.mxu0 %vm125_vm0, %v94_v14  ;;  %p1882_p1 = por %p1881_p0, %p1880_p13 }
  0x66   :  { %1511 = vmatprep.subr.bf16.mxu0 %v1510_v13 }
  0x67   :  { %p1883_p2 = pnand %p1882_p1, %p1876_p12 }
  0x69   :  { %1513 = vmatpush3.bf16.msra.mxu0 %v1510_v13 }
  0x6a   :  { %1515 = vmatprep.subr.bf16.mxu0 %v1514_v21 }
  0x6c   :  { %1362 = vmatmul.mubr.msk.f32.vlgmr.msra.gmra.mrb[2].mxu0 %vm125_vm0, %v95_v15  ;;  %v1216_v15 = vld [vmem:[%s2314_s4 + $0x2] ss:$0 sm:$0xff] }
  0x6d   :  { %1517 = vmatpush3.bf16.msra.mxu0 %v1514_v21  ;;  %1372 = vmatprep.mubr.msk.f32.mxu0 %vm125_vm0, %v96_v30 }
  0x6e   :  { %1519 = vmatprep.subr.bf16.mxu0 %v1518_v25 }
  0x71   :  { %1521 = vmatpush3.bf16.msra.mxu0 %v1518_v25 }
  0x74   :  { %1373 = vmatmul.mubr.msk.f32.vlgmr.msra.gmra.mrb[4].mxu0 %vm125_vm0, %v97_v32 }
 0x137   :  { %v1352_v17 = vpop.f32.mrb[0].mxu0 }
 0x138   :  { %v198_v20 = vpop.f32.mrb[1].mxu0  ;;  %v204_v36 = vadd.f32 %v1352_v17, %v1210_v16 }
 0x139   :  { %v199_v22 = vadd.f32 %v1210_v16, %v198_v20 }
 0x13b   :  { %1407 = vmatprep.mubr.msk.f32.mxu1 %vm481_vm1, %v199_v22 }
 0x13f   :  { %v1363_v27 = vpop.f32.mrb[2].mxu0 }
 0x140   :  { %v289_v28 = vadd.f32 %v1363_v27, %v1213_v26  ;;  %v283_v29 = vpop.f32.mrb[3].mxu0 }
 0x141   :  { %v284_v31 = vadd.f32 %v1213_v26, %v283_v29 }
 0x143   :  { %v1641_v33 = vpack.i.bf16 %v289_v28, %v284_v31  ;;  %v1522_v34 = vpack.c.bf16 %v289_v28, %v284_v31 }
 0x145   :  { %1642 = vrot.lane.b32.xlu1 %v1641_v33, %s1912_s12  ;;  %1632 = vrot.lane.b32.xlu0 %v1641_v33, %s1913_s13 }
 0x146   :  { %1524 = vmatprep.subr.msk.bf16.mxu1 %vm2065_vm2, %v1522_v34 }
 0x147   :  { %1527 = vmatpush3.bf16.xpose.msk.msra.mxu1 %vm2065_vm2, %v1522_v34  ;;  %v1374_v16 = vpop.f32.mrb[4].mxu0 }
 0x148   :  { %v374_v17 = vadd.f32 %v1374_v16, %v1216_v15  ;;  %v368_v18 = vpop.f32.mrb[5].mxu0 }
 0x149   :  { %1647 = vrot.lane.b32.xlu1 %v1641_v33, %s1914_s14  ;;  %1637 = vrot.lane.b32.xlu0 %v1641_v33, %s1915_s15  ;;  %v369_v19 = vadd.f32 %v1216_v15, %v368_v18  ;;  %v718_v15 = vld [vmem:[#allocation10 + $0x58] sm:$0xff]  ;;  %v717_v18 = vld [vmem:[#allocation10 + $0x50] sm:$0xff] }
 0x14b   :  { %v2140_v20 = vpack.i.bf16 %v374_v17, %v369_v19  ;;  %v1570_v21 = vpack.c.bf16 %v374_v17, %v369_v19 }
 0x14d   :  { %1657 = vrot.lane.b32.xlu1 %v1641_v33, %s1916_s16  ;;  %1652 = vrot.lane.b32.xlu0 %v1641_v33, %s1917_s17 }
 0x14e   :  { %1571 = vmatprep.subr.bf16.mxu0 %v1570_v21 }
 0x14f   :  { %1573 = vmatpush3.bf16.msra.mxu0 %v1570_v21 }
 0x151   :  { %1662 = vrot.lane.b32.xlu0 %v1641_v33, %s1918_s18  ;;  %379 = vrot.lane.b32.xlu1 %v199_v22, %s1913_s13 }
 0x155   :  { %381 = vrot.lane.b32.xlu0 %v204_v36, %s1913_s13  ;;  %383 = vrot.lane.b32.xlu1 %v199_v22, %s1915_s15 }
 0x159   :  { %385 = vrot.lane.b32.xlu0 %v204_v36, %s1915_s15  ;;  %387 = vrot.lane.b32.xlu1 %v199_v22, %s1912_s12 }
 0x15d   :  { %389 = vrot.lane.b32.xlu0 %v204_v36, %s1912_s12  ;;  %391 = vrot.lane.b32.xlu1 %v199_v22, %s1914_s14 }
 0x161   :  { %393 = vrot.lane.b32.xlu0 %v204_v36, %s1914_s14  ;;  %395 = vrot.lane.b32.xlu1 %v199_v22, %s1917_s17 }
 0x165   :  { %397 = vrot.lane.b32.xlu0 %v204_v36, %s1917_s17  ;;  %399 = vrot.lane.b32.xlu1 %v199_v22, %s1916_s16 }
 0x169   :  { %401 = vrot.lane.b32.xlu0 %v204_v36, %s1916_s16  ;;  %403 = vrot.lane.b32.xlu1 %v199_v22, %s1918_s18 }
 0x16d   :  { %405 = vrot.lane.b32.xlu0 %v204_v36, %s1918_s18  ;;  %1672 = vrot.lane.b32.xlu1 %v2140_v20, %s1915_s15 }
 0x171   :  { %1667 = vrot.lane.b32.xlu0 %v2140_v20, %s1913_s13  ;;  %1682 = vrot.lane.b32.xlu1 %v2140_v20, %s1914_s14 }
 0x175   :  { %1677 = vrot.lane.b32.xlu0 %v2140_v20, %s1912_s12 }
 0x1b7   :  { %v1633_v37 = vpop.permute.xlu0 %1632  ;;  %v1643_v44 = vpop.permute.xlu1 %1642 }
 0x1b8   :  { %v1635_v38 = vunpack.i.h.bf16 %v1633_v37  ;;  %v1634_v39 = vunpack.i.l.bf16 %v1633_v37  ;;  %v1645_v46 = vunpack.i.h.bf16 %v1643_v44  ;;  %v1644_v47 = vunpack.i.l.bf16 %v1643_v44 }
 0x1ba   :  { %v1528_v40 = vpack.c.bf16 %v1635_v38, %v1634_v39  ;;  %v1540_v48 = vpack.c.bf16 %v1645_v46, %v1644_v47  ;;  %v708_v39 = vld [vmem:[#allocation10 + $0x8] sm:$0xff]  ;;  %v710_v47 = vld [vmem:[#allocation10 + $0x18] sm:$0xff] }
 0x1bb   :  { %v1638_v41 = vpop.permute.xlu0 %1637  ;;  %v1648_v49 = vpop.permute.xlu1 %1647 }
 0x1bc   :  { %v1640_v42 = vunpack.i.h.bf16 %v1638_v41  ;;  %v1639_v43 = vunpack.i.l.bf16 %v1638_v41  ;;  %1530 = vmatprep.subr.msk.bf16.mxu1 %vm2065_vm2, %v1528_v40  ;;  %v1650_v50 = vunpack.i.h.bf16 %v1648_v49  ;;  %v1649_v51 = vunpack.i.l.bf16 %v1648_v49 }
 0x1bd   :  { %1533 = vmatpush3.bf16.xpose.msk.msra.mxu1 %vm2065_vm2, %v1528_v40 }
 0x1be   :  { %v1534_v45 = vpack.c.bf16 %v1640_v42, %v1639_v43  ;;  %v1546_v52 = vpack.c.bf16 %v1650_v50, %v1649_v51  ;;  %v707_v42 = vld [vmem:[#allocation10] sm:$0xff]  ;;  %v709_v50 = vld [vmem:[#allocation10 + $0x10] sm:$0xff] }
 0x1bf   :  { %v1653_v53 = vpop.permute.xlu0 %1652  ;;  %v1658_v57 = vpop.permute.xlu1 %1657 }
 0x1c0   :  { %1536 = vmatprep.subr.msk.bf16.mxu1 %vm2065_vm2, %v1534_v45  ;;  %v1655_v54 = vunpack.i.h.bf16 %v1653_v53  ;;  %v1654_v55 = vunpack.i.l.bf16 %v1653_v53  ;;  %v1660_v58 = vunpack.i.h.bf16 %v1658_v57  ;;  %v1659_v59 = vunpack.i.l.bf16 %v1658_v57 }
 0x1c2   :  { %v1552_v56 = vpack.c.bf16 %v1655_v54, %v1654_v55  ;;  %v1558_v60 = vpack.c.bf16 %v1660_v58, %v1659_v59  ;;  %v712_v55 = vld [vmem:[#allocation10 + $0x28] sm:$0xff]  ;;  %v711_v58 = vld [vmem:[#allocation10 + $0x20] sm:$0xff] }
 0x1c3   :  { %v1663_v61 = vpop.permute.xlu0 %1662  ;;  %v380_v1 = vpop.permute.xlu1 %379 }
 0x1c4   :  { %v1665_v62 = vunpack.i.h.bf16 %v1663_v61  ;;  %v1664_v63 = vunpack.i.l.bf16 %v1663_v61 }
 0x1c5   :  { %1539 = vmatpush3.bf16.xpose.msk.msra.mxu1 %vm2065_vm2, %v1534_v45 }
 0x1c6   :  { %1542 = vmatprep.subr.msk.bf16.mxu1 %vm2065_vm2, %v1540_v48  ;;  %v1564_v0 = vpack.c.bf16 %v1665_v62, %v1664_v63  ;;  %v714_v63 = vld [vmem:[#allocation10 + $0x38] sm:$0xff] }
 0x1c7   :  { %v382_v2 = vpop.permute.xlu0 %381  ;;  %v384_v3 = vpop.permute.xlu1 %383 }
 0x1cb   :  { %v386_v4 = vpop.permute.xlu0 %385  ;;  %v388_v5 = vpop.permute.xlu1 %387 }
 0x1cd   :  { %1545 = vmatpush3.bf16.xpose.msk.msra.mxu1 %vm2065_vm2, %v1540_v48 }
 0x1ce   :  { %1548 = vmatprep.subr.msk.bf16.mxu1 %vm2065_vm2, %v1546_v52 }
 0x1cf   :  { %v390_v6 = vpop.permute.xlu0 %389  ;;  %v392_v7 = vpop.permute.xlu1 %391 }
 0x1d3   :  { %v394_v8 = vpop.permute.xlu0 %393  ;;  %v396_v9 = vpop.permute.xlu1 %395 }
 0x1d5   :  { %1551 = vmatpush3.bf16.xpose.msk.msra.mxu1 %vm2065_vm2, %v1546_v52 }
 0x1d6   :  { %1554 = vmatprep.subr.msk.bf16.mxu1 %vm2065_vm2, %v1552_v56 }
 0x1d7   :  { %v398_v10 = vpop.permute.xlu0 %397  ;;  %v400_v11 = vpop.permute.xlu1 %399 }
 0x1db   :  { %v402_v12 = vpop.permute.xlu0 %401  ;;  %v404_v13 = vpop.permute.xlu1 %403 }
 0x1dd   :  { %1557 = vmatpush3.bf16.xpose.msk.msra.mxu1 %vm2065_vm2, %v1552_v56 }
 0x1de   :  { %1560 = vmatprep.subr.msk.bf16.mxu1 %vm2065_vm2, %v1558_v60 }
 0x1df   :  { %v406_v14 = vpop.permute.xlu0 %405  ;;  %v1673_v23 = vpop.permute.xlu1 %1672 }
 0x1e0   :  { %v1675_v26 = vunpack.i.h.bf16 %v1673_v23  ;;  %v1674_v27 = vunpack.i.l.bf16 %v1673_v23 }
 0x1e2   :  { %v1578_v29 = vpack.c.bf16 %v1675_v26, %v1674_v27  ;;  %v719_v27 = vld [vmem:[#allocation10 + $0x60] sm:$0xff] }
 0x1e3   :  { %v1668_v22 = vpop.permute.xlu0 %1667  ;;  %v1683_v31 = vpop.permute.xlu1 %1682 }
 0x1e4   :  { %v1670_v24 = vunpack.i.h.bf16 %v1668_v22  ;;  %v1669_v25 = vunpack.i.l.bf16 %v1668_v22  ;;  %v1685_v35 = vunpack.i.h.bf16 %v1683_v31 }
 0x1e5   :  { %1563 = vmatpush3.bf16.xpose.msk.msra.mxu1 %vm2065_vm2, %v1558_v60 }
 0x1e6   :  { %1566 = vmatprep.subr.msk.bf16.mxu1 %vm2065_vm2, %v1564_v0  ;;  %v1574_v28 = vpack.c.bf16 %v1670_v24, %v1669_v25  ;;  %v720_v24 = vld [vmem:[#allocation10 + $0x68] sm:$0xff] }
 0x1e7   :  { %v1678_v30 = vpop.permute.xlu0 %1677 }
 0x1e8   :  { %1575 = vmatprep.subr.bf16.mxu0 %v1574_v28  ;;  %v1680_v32 = vunpack.i.h.bf16 %v1678_v30  ;;  %v1679_v33 = vunpack.i.l.bf16 %v1678_v30 }
 0x1e9   :  { %1577 = vmatpush3.bf16.msra.mxu0 %v1574_v28 }
 0x1ea   :  { %v1582_v34 = vpack.c.bf16 %v1680_v32, %v1679_v33  ;;  %1579 = vmatprep.subr.bf16.mxu0 %v1578_v29  ;;  %v722_v32 = vld [vmem:[#allocation10 + $0x78] sm:$0xff] }
 0x1ed   :  { %1569 = vmatpush3.bf16.xpose.msk.msra.mxu1 %vm2065_vm2, %v1564_v0  ;;  %1581 = vmatpush3.bf16.msra.mxu0 %v1578_v29 }
 0x1ee   :  { %1583 = vmatprep.subr.bf16.mxu0 %v1582_v34 }
 0x1f1   :  { %1585 = vmatpush3.bf16.msra.mxu0 %v1582_v34 }
 0x1f4   :  { %1408 = vmatmul.mubr.msk.f32.vlgmr.msra.gmra.mrb[0].mxu1 %vm481_vm1, %v204_v36  ;;  %v1684_v36 = vunpack.i.l.bf16 %v1683_v31 }
 0x1f5   :  { %1410 = vmatprep.mubr.msk.f32.mxu1 %vm481_vm1, %v380_v1 }
 0x1f6   :  { %v1586_v37 = vpack.c.bf16 %v1685_v35, %v1684_v36  ;;  %v721_v35 = vld [vmem:[#allocation10 + $0x70] sm:$0xff] }
 0x1f8   :  { %1411 = vmatmul.mubr.msk.f32.gmra.mrb[2].mxu1 %vm481_vm1, %v382_v2  ;;  %1587 = vmatprep.subr.bf16.mxu0 %v1586_v37  ;;  %v713_v2 = vld [vmem:[#allocation10 + $0x30] sm:$0xff] }
 0x1f9   :  { %1413 = vmatprep.mubr.msk.f32.mxu1 %vm481_vm1, %v384_v3  ;;  %1589 = vmatpush3.bf16.msra.mxu0 %v1586_v37 }
 0x1fc   :  { %1414 = vmatmul.mubr.msk.f32.gmra.mrb[4].mxu1 %vm481_vm1, %v386_v4 }
 0x1fd   :  { %1416 = vmatprep.mubr.msk.f32.mxu1 %vm481_vm1, %v388_v5 }
 0x200   :  { %1417 = vmatmul.mubr.msk.f32.gmra.mrb[6].mxu1 %vm481_vm1, %v390_v6 }
 0x201   :  { %1419 = vmatprep.mubr.msk.f32.mxu1 %vm481_vm1, %v392_v7  ;;  %v716_v7 = vld [vmem:[#allocation10 + $0x48] sm:$0xff] }
 0x204   :  { %1420 = vmatmul.mubr.msk.f32.gmra.mrb[8].mxu1 %vm481_vm1, %v394_v8 }
 0x205   :  { %1422 = vmatprep.mubr.msk.f32.mxu1 %vm481_vm1, %v396_v9 }
 0x208   :  { %1423 = vmatmul.mubr.msk.f32.gmra.mrb[10].mxu1 %vm481_vm1, %v398_v10  ;;  %v715_v10 = vld [vmem:[#allocation10 + $0x40] sm:$0xff] }
 0x209   :  { %1425 = vmatprep.mubr.msk.f32.mxu1 %vm481_vm1, %v400_v11 }
 0x20c   :  { %1426 = vmatmul.mubr.msk.f32.gmra.mrb[12].mxu1 %vm481_vm1, %v402_v12 }
 0x20d   :  { %1428 = vmatprep.mubr.msk.f32.mxu1 %vm481_vm1, %v404_v13 }
 0x210   :  { %1429 = vmatmul.mubr.msk.f32.gmra.mrb[14].mxu1 %vm481_vm1, %v406_v14 }
 0x2c7   :  { %v1409_v38 = vpop.f32.mrb[0].mxu1 }
 0x2c8   :  { %v692_v40 = vmul.f32 0.5, %v1409_v38  ;;  %v612_v41 = vpop.f32.mrb[1].mxu1 }
 0x2c9   :  { %v691_v43 = vmul.f32 0.5, %v612_v41 }
 0x2ca   :  { %v2150_v44 = vadd.f32 %v708_v39, %v692_v40 }
 0x2cb   :  { %v1412_v45 = vpop.f32.mrb[2].mxu1  ;;  %v2152_v46 = vadd.f32 %v707_v42, %v691_v43 }
 0x2cc   :  { %v694_v48 = vmul.f32 0.5, %v1412_v45  ;;  %741 = vmax.xlane.f32.xlu0 %v2150_v44  ;;  %v622_v49 = vpop.f32.mrb[3].mxu1 }
 0x2cd   :  { %v693_v51 = vmul.f32 0.5, %v622_v49  ;;  %739 = vmax.xlane.f32.xlu1 %v2152_v46 }
 0x2ce   :  { %v2156_v52 = vadd.f32 %v710_v47, %v694_v48 }
 0x2cf   :  { %v1415_v53 = vpop.f32.mrb[4].mxu1  ;;  %v2158_v54 = vadd.f32 %v709_v50, %v693_v51 }
 0x2d0   :  { %v696_v56 = vmul.f32 0.5, %v1415_v53  ;;  %v632_v57 = vpop.f32.mrb[5].mxu1 }
 0x2d1   :  { %v695_v59 = vmul.f32 0.5, %v632_v57  ;;  %745 = vmax.xlane.f32.xlu1 %v2156_v52  ;;  %743 = vmax.xlane.f32.xlu0 %v2158_v54 }
 0x2d2   :  { %v2162_v60 = vadd.f32 %v712_v55, %v696_v56 }
 0x2d3   :  { %v1418_v61 = vpop.f32.mrb[6].mxu1  ;;  %v2164_v62 = vadd.f32 %v711_v58, %v695_v59 }
 0x2d4   :  { %v698_v0 = vmul.f32 0.5, %v1418_v61  ;;  %v642_v1 = vpop.f32.mrb[7].mxu1 }
 0x2d5   :  { %v697_v3 = vmul.f32 0.5, %v642_v1  ;;  %749 = vmax.xlane.f32.xlu1 %v2162_v60  ;;  %747 = vmax.xlane.f32.xlu0 %v2164_v62 }
 0x2d6   :  { %v2168_v4 = vadd.f32 %v714_v63, %v698_v0 }
 0x2d7   :  { %v1421_v5 = vpop.f32.mrb[8].mxu1  ;;  %v2170_v6 = vadd.f32 %v713_v2, %v697_v3 }
 0x2d8   :  { %v700_v8 = vmul.f32 0.5, %v1421_v5  ;;  %v652_v9 = vpop.f32.mrb[9].mxu1 }
 0x2d9   :  { %v699_v11 = vmul.f32 0.5, %v652_v9  ;;  %753 = vmax.xlane.f32.xlu1 %v2168_v4  ;;  %751 = vmax.xlane.f32.xlu0 %v2170_v6 }
 0x2da   :  { %v2174_v12 = vadd.f32 %v716_v7, %v700_v8 }
 0x2db   :  { %v1424_v13 = vpop.f32.mrb[10].mxu1  ;;  %v2176_v14 = vadd.f32 %v715_v10, %v699_v11 }
 0x2dc   :  { %v702_v16 = vmul.f32 0.5, %v1424_v13  ;;  %v662_v17 = vpop.f32.mrb[11].mxu1 }
 0x2dd   :  { %v701_v19 = vmul.f32 0.5, %v662_v17  ;;  %757 = vmax.xlane.f32.xlu1 %v2174_v12  ;;  %755 = vmax.xlane.f32.xlu0 %v2176_v14 }
 0x2de   :  { %v2180_v21 = vadd.f32 %v718_v15, %v702_v16 }
 0x2df   :  { %v1427_v22 = vpop.f32.mrb[12].mxu1  ;;  %v2182_v23 = vadd.f32 %v717_v18, %v701_v19 }
 0x2e0   :  { %v704_v25 = vmul.f32 0.5, %v1427_v22  ;;  %v672_v26 = vpop.f32.mrb[13].mxu1 }
 0x2e1   :  { %v703_v28 = vmul.f32 0.5, %v672_v26  ;;  %761 = vmax.xlane.f32.xlu1 %v2180_v21  ;;  %759 = vmax.xlane.f32.xlu0 %v2182_v23 }
 0x2e2   :  { %v2186_v29 = vadd.f32 %v720_v24, %v704_v25 }
 0x2e3   :  { %v1430_v30 = vpop.f32.mrb[14].mxu1  ;;  %v2188_v31 = vadd.f32 %v719_v27, %v703_v28 }
 0x2e4   :  { %v706_v33 = vmul.f32 0.5, %v1430_v30  ;;  %v682_v34 = vpop.f32.mrb[15].mxu1 }
 0x2e5   :  { %v705_v36 = vmul.f32 0.5, %v682_v34  ;;  %765 = vmax.xlane.f32.xlu1 %v2186_v29  ;;  %763 = vmax.xlane.f32.xlu0 %v2188_v31 }
 0x2e6   :  { %v2192_v37 = vadd.f32 %v722_v32, %v706_v33 }
 0x2e7   :  { %v2194_v38 = vadd.f32 %v721_v35, %v705_v36 }
 0x2e9   :  { %769 = vmax.xlane.f32.xlu1 %v2192_v37  ;;  %767 = vmax.xlane.f32.xlu0 %v2194_v38 }
 0x2ff   :  { %1687 = vrot.lane.b32.xlu0 %v2140_v20, %s1917_s17 }
 0x359   :  { %v742_v39 = vpop.xlane.xlu0 %741 }
 0x35a   :  { %v772_v40 = vsub.f32 %v2150_v44, %v742_v39  ;;  %v740_v41 = vpop.xlane.xlu1 %739 }
 0x35b   :  { %v771_v42 = vsub.f32 %v2152_v46, %v740_v41 }
 0x35c   :  { %v789_v43 = vmul.f32 1.442695, %v772_v40 }
 0x35d   :  { %v787_v45 = vmul.f32 1.442695, %v771_v42 }
 0x35e   :  { %1701 = vpow2.f32 %v789_v43  ;;  %v746_v47 = vpop.xlane.xlu1 %745  ;;  %v744_v48 = vpop.xlane.xlu0 %743 }
 0x35f   :  { %v774_v49 = vsub.f32 %v2156_v52, %v746_v47  ;;  %v773_v50 = vsub.f32 %v2158_v54, %v744_v48  ;;  %1703 = vpow2.f32 %v787_v45 }
 0x361   :  { %v791_v51 = vmul.f32 1.442695, %v773_v50  ;;  %v793_v53 = vmul.f32 1.442695, %v774_v49 }
 0x362   :  { %v750_v55 = vpop.xlane.xlu1 %749  ;;  %v748_v56 = vpop.xlane.xlu0 %747 }
 0x363   :  { %v776_v57 = vsub.f32 %v2162_v60, %v750_v55  ;;  %1705 = vpow2.f32 %v791_v51  ;;  %v775_v46 = vsub.f32 %v2164_v62, %v748_v56 }
 0x364   :  { %1707 = vpow2.f32 %v793_v53 }
 0x365   :  { %v797_v44 = vmul.f32 1.442695, %v776_v57  ;;  %v795_v54 = vmul.f32 1.442695, %v775_v46 }
 0x366   :  { %v752_v58 = vpop.xlane.xlu0 %751  ;;  %v754_v59 = vpop.xlane.xlu1 %753 }
 0x367   :  { %v777_v61 = vsub.f32 %v2170_v6, %v752_v58  ;;  %1709 = vpow2.f32 %v797_v44  ;;  %v778_v0 = vsub.f32 %v2168_v4, %v754_v59 }
 0x368   :  { %v2207_v63 = vpop.eup %1701 }
 0x369   :  { %v799_v52 = vmul.f32 1.442695, %v777_v61  ;;  %821 = vadd.xlane.f32.xlu1 %v2207_v63  ;;  %v2211_v60 = vpop.eup %1703  ;;  %v801_v2 = vmul.f32 1.442695, %v778_v0 }
 0x36a   :  { %v756_v1 = vpop.xlane.xlu0 %755  ;;  %v758_v17 = vpop.xlane.xlu1 %757 }
 0x36b   :  { %1711 = vpow2.f32 %v799_v52  ;;  %v780_v26 = vsub.f32 %v2174_v12, %v758_v17  ;;  %v779_v33 = vsub.f32 %v2176_v14, %v756_v1 }
 0x36c   :  { %1713 = vpow2.f32 %v795_v54 }
 0x36d   :  { %819 = vadd.xlane.f32.xlu1 %v2211_v60  ;;  %v2214_v62 = vpop.eup %1705  ;;  %1715 = vpow2.f32 %v801_v2  ;;  %v805_v32 = vmul.f32 1.442695, %v780_v26 }
 0x36e   :  { %v760_v3 = vpop.xlane.xlu0 %759  ;;  %823 = vadd.xlane.f32.xlu0 %v2214_v62  ;;  %v2217_v5 = vpop.eup %1707 }
 0x36f   :  { %v762_v18 = vpop.xlane.xlu1 %761  ;;  %v781_v35 = vsub.f32 %v2182_v23, %v760_v3 }
 0x370   :  { %v782_v19 = vsub.f32 %v2180_v21, %v762_v18  ;;  %v803_v21 = vmul.f32 1.442695, %v779_v33 }
 0x371   :  { %825 = vadd.xlane.f32.xlu1 %v2217_v5  ;;  %v2220_v4 = vpop.eup %1709  ;;  %v807_v12 = vmul.f32 1.442695, %v781_v35 }
 0x372   :  { %v764_v6 = vpop.xlane.xlu0 %763  ;;  %v809_v24 = vmul.f32 1.442695, %v782_v19 }
 0x373   :  { %v766_v22 = vpop.xlane.xlu1 %765 }
 0x374   :  { %v784_v25 = vsub.f32 %v2186_v29, %v766_v22  ;;  %1717 = vpow2.f32 %v809_v24 }
 0x375   :  { %829 = vadd.xlane.f32.xlu1 %v2220_v4  ;;  %v2223_v7 = vpop.eup %1711 }
 0x376   :  { %v768_v8 = vpop.xlane.xlu0 %767  ;;  %831 = vadd.xlane.f32.xlu0 %v2223_v7  ;;  %v2226_v9 = vpop.eup %1713  ;;  %v813_v27 = vmul.f32 1.442695, %v784_v25 }
 0x377   :  { %v2229_v15 = vpop.eup %1715  ;;  %v785_v28 = vsub.f32 %v2194_v38, %v768_v8  ;;  %v770_v30 = vpop.xlane.xlu1 %769  ;;  %v783_v38 = vsub.f32 %v2188_v31, %v764_v6 }
 0x378   :  { %1719 = vpow2.f32 %v813_v27 }
 0x379   :  { %827 = vadd.xlane.f32.xlu1 %v2226_v9  ;;  %v815_v34 = vmul.f32 1.442695, %v785_v28  ;;  %1721 = vpow2.f32 %v805_v32 }
 0x37a   :  { %v1688_v10 = vpop.permute.xlu0 %1687 }
 0x37b   :  { %v1690_v11 = vunpack.i.h.bf16 %v1688_v10  ;;  %v1689_v13 = vunpack.i.l.bf16 %v1688_v10  ;;  %1723 = vpow2.f32 %v815_v34 }
 0x37c   :  { %1725 = vpow2.f32 %v803_v21 }
 0x37d   :  { %v1590_v16 = vpack.c.bf16 %v1690_v11, %v1689_v13  ;;  %833 = vadd.xlane.f32.xlu1 %v2229_v15 }
 0x37e   :  { %v2243_v29 = vpop.eup %1717 }
 0x37f   :  { %1591 = vmatprep.subr.bf16.mxu0 %v1590_v16 }
 0x380   :  { %1593 = vmatpush3.bf16.msra.mxu0 %v1590_v16 }
 0x382   :  { %v2247_v14 = vpop.eup %1719 }
 0x383   :  { %v2250_v39 = vpop.eup %1721 }
 0x385   :  { %v2253_v23 = vpop.eup %1723 }
 0x386   :  { %v2256_v40 = vpop.eup %1725 }
 0x38c   :  { %1692 = vrot.lane.b32.xlu0 %v2140_v20, %s1916_s16 }
 0x38e   :  { %1697 = vrot.lane.b32.xlu1 %v2140_v20, %s1918_s18  ;;  %v786_v20 = vsub.f32 %v2192_v37, %v770_v30  ;;  %v811_v37 = vmul.f32 1.442695, %v783_v38 }
 0x390   :  { %v817_v36 = vmul.f32 1.442695, %v786_v20 }
 0x392   :  { %1727 = vpow2.f32 %v817_v36 }
 0x393   :  { %1729 = vpow2.f32 %v807_v12 }
 0x394   :  { %1731 = vpow2.f32 %v811_v37 }
 0x39c   :  { %v2259_v31 = vpop.eup %1727 }
 0x39d   :  { %v2262_v41 = vpop.eup %1729 }
 0x39e   :  { %v2265_v42 = vpop.eup %1731 }
 0x3ab   :  { %841 = vadd.xlane.f32.xlu0 %v2243_v29 }
 0x3af   :  { %845 = vadd.xlane.f32.xlu0 %v2247_v14 }
 0x3b2   :  { %837 = vadd.xlane.f32.xlu1 %v2250_v39 }
 0x3b3   :  { %847 = vadd.xlane.f32.xlu0 %v2253_v23 }
 0x3b6   :  { %835 = vadd.xlane.f32.xlu1 %v2256_v40 }
 0x3b7   :  { %849 = vadd.xlane.f32.xlu0 %v2259_v31 }
 0x3ba   :  { %839 = vadd.xlane.f32.xlu1 %v2262_v41 }
 0x3be   :  { %843 = vadd.xlane.f32.xlu1 %v2265_v42 }
 0x3f6   :  { %v822_v43 = vpop.xlane.xlu1 %821 }
 0x3fa   :  { %v820_v45 = vpop.xlane.xlu1 %819 }
 0x3fb   :  { %1733 = vrcp.f32 %v820_v45  ;;  %v824_v48 = vpop.xlane.xlu0 %823  ;;  %v114_v45 = vld [vmem:[#allocation8 + $0x68] sm:$0xff] }
 0x3fc   :  { %1735 = vrcp.f32 %v822_v43  ;;  %v113_v43 = vld [vmem:[#allocation8 + $0x60] sm:$0xff] }
 0x3fd   :  { %1737 = vrcp.f32 %v824_v48 }
 0x3fe   :  { %v826_v47 = vpop.xlane.xlu1 %825 }
 0x3ff   :  { %1739 = vrcp.f32 %v826_v47  ;;  %v116_v47 = vld [vmem:[#allocation8 + $0x78] sm:$0xff] }
 0x402   :  { %v830_v49 = vpop.xlane.xlu1 %829 }
 0x403   :  { %v832_v50 = vpop.xlane.xlu0 %831 }
 0x405   :  { %v1734_v51 = vpop.eup %1733 }
 0x406   :  { %v828_v53 = vpop.xlane.xlu1 %827  ;;  %v867_v55 = vmul.f32 %v1734_v51, %v2211_v60  ;;  %v1736_v0 = vpop.eup %1735 }
 0x407   :  { %v1693_v56 = vpop.permute.xlu0 %1692  ;;  %1741 = vrcp.f32 %v828_v53  ;;  %v1738_v1 = vpop.eup %1737  ;;  %v868_v60 = vmul.f32 %v1736_v0, %v2207_v63 }
 0x408   :  { %1463 = vmatprep.mubr.f32.mxu0 %v867_v55  ;;  %v1695_v57 = vunpack.i.h.bf16 %v1693_v56  ;;  %v1694_v44 = vunpack.i.l.bf16 %v1693_v56  ;;  %1743 = vrcp.f32 %v830_v49  ;;  %v869_v3 = vmul.f32 %v1738_v1, %v2214_v62 }
 0x409   :  { %1745 = vrcp.f32 %v832_v50  ;;  %v1740_v2 = vpop.eup %1739 }
 0x40a   :  { %v834_v46 = vpop.xlane.xlu1 %833  ;;  %v1594_v58 = vpack.c.bf16 %v1695_v57, %v1694_v44  ;;  %v870_v8 = vmul.f32 %v1740_v2, %v2217_v5 }
 0x40b   :  { %1747 = vrcp.f32 %v834_v46 }
 0x40c   :  { %1595 = vmatprep.subr.bf16.mxu0 %v1594_v58 }
 0x40d   :  { %1597 = vmatpush3.bf16.msra.mxu0 %v1594_v58 }
 0x40e   :  { %v1698_v59 = vpop.permute.xlu1 %1697 }
 0x40f   :  { %v1700_v61 = vunpack.i.h.bf16 %v1698_v59  ;;  %v1699_v52 = vunpack.i.l.bf16 %v1698_v59 }
 0x411   :  { %v1598_v54 = vpack.c.bf16 %v1700_v61, %v1699_v52  ;;  %v1742_v6 = vpop.eup %1741 }
 0x412   :  { %v1744_v10 = vpop.eup %1743  ;;  %v871_v11 = vmul.f32 %v1742_v6, %v2226_v9 }
 0x413   :  { %1599 = vmatprep.subr.bf16.mxu0 %v1598_v54  ;;  %v1746_v13 = vpop.eup %1745  ;;  %v872_v16 = vmul.f32 %v1744_v10, %v2220_v4 }
 0x414   :  { %1601 = vmatpush3.bf16.msra.mxu0 %v1598_v54  ;;  %v873_v18 = vmul.f32 %v1746_v13, %v2223_v7 }
 0x415   :  { %v1748_v17 = vpop.eup %1747 }
 0x416   :  { %v874_v63 = vmul.f32 %v1748_v17, %v2229_v15 }
 0x417   :  { %1464 = vmatmul.mubr.f32.vlgmr.msra.gmra.mrb[6].mxu0 %v868_v60 }
 0x418   :  { %1466 = vmatprep.mubr.f32.mxu0 %v869_v3 }
 0x41b   :  { %1467 = vmatmul.mubr.f32.gmra.mrb[8].mxu0 %v870_v8 }
 0x41c   :  { %1469 = vmatprep.mubr.f32.mxu0 %v871_v11 }
 0x41f   :  { %1470 = vmatmul.mubr.f32.gmra.mrb[10].mxu0 %v872_v16 }
 0x420   :  { %1472 = vmatprep.mubr.f32.mxu0 %v873_v18 }
 0x423   :  { %1473 = vmatmul.mubr.f32.gmra.mrb[12].mxu0 %v874_v63 }
 0x438   :  { %v842_v62 = vpop.xlane.xlu0 %841 }
 0x43c   :  { %v846_v22 = vpop.xlane.xlu0 %845 }
 0x43f   :  { %v838_v19 = vpop.xlane.xlu1 %837 }
 0x440   :  { %1749 = vrcp.f32 %v838_v19  ;;  %v848_v9 = vpop.xlane.xlu0 %847 }
 0x443   :  { %v836_v5 = vpop.xlane.xlu1 %835 }
 0x444   :  { %1751 = vrcp.f32 %v836_v5  ;;  %v850_v25 = vpop.xlane.xlu0 %849 }
 0x445   :  { %1753 = vrcp.f32 %v842_v62 }
 0x447   :  { %v840_v24 = vpop.xlane.xlu1 %839 }
 0x448   :  { %1755 = vrcp.f32 %v840_v24 }
 0x449   :  { %1757 = vrcp.f32 %v846_v22 }
 0x44a   :  { %1759 = vrcp.f32 %v848_v9  ;;  %v1750_v7 = vpop.eup %1749 }
 0x44b   :  { %v844_v4 = vpop.xlane.xlu1 %843  ;;  %v876_v27 = vmul.f32 %v1750_v7, %v2250_v39 }
 0x44c   :  { %1761 = vrcp.f32 %v844_v4 }
 0x44d   :  { %1763 = vrcp.f32 %v850_v25 }
 0x44e   :  { %v1752_v26 = vpop.eup %1751 }
 0x44f   :  { %v875_v15 = vmul.f32 %v1752_v26, %v2256_v40  ;;  %v1754_v28 = vpop.eup %1753 }
 0x450   :  { %v878_v20 = vmul.f32 %v1754_v28, %v2243_v29 }
 0x451   :  { %1475 = vmatprep.mubr.f32.mxu0 %v875_v15  ;;  %v1251_v15 = vld [vmem:[%s2314_s4 + $0x3] ss:$0 sm:$0xff] }
 0x452   :  { %v1756_v30 = vpop.eup %1755  ;;  %1476 = vmatmul.mubr.f32.gmra.mrb[14].mxu0 %v876_v27 }
 0x453   :  { %v877_v32 = vmul.f32 %v1756_v30, %v2262_v41  ;;  %v1758_v33 = vpop.eup %1757 }
 0x454   :  { %v1760_v34 = vpop.eup %1759  ;;  %v880_v36 = vmul.f32 %v1758_v33, %v2247_v14  ;;  %v1602_v14 = vpack.c.bf16 %v114_v45, %v113_v43 }
 0x455   :  { %1478 = vmatprep.mubr.f32.mxu0 %v877_v32  ;;  %v881_v38 = vmul.f32 %v1760_v34, %v2253_v23 }
 0x456   :  { %v1762_v21 = vpop.eup %1761  ;;  %1479 = vmatmul.mubr.f32.gmra.mrb[16].mxu0 %v878_v20  ;;  %1603 = vmatprep.subr.bf16.mxu0 %v1602_v14 }
 0x457   :  { %v879_v35 = vmul.f32 %v1762_v21, %v2265_v42  ;;  %v1764_v12 = vpop.eup %1763  ;;  %v115_v42 = vld [vmem:[#allocation8 + $0x70] sm:$0xff]  ;;  %1605 = vmatpush3.bf16.msra.mxu0 %v1602_v14 }
 0x458   :  { %v882_v37 = vmul.f32 %v1764_v12, %v2259_v31  ;;  %v1606_v48 = vpack.c.bf16 %v116_v47, %v115_v42 }
 0x459   :  { %1481 = vmatprep.mubr.f32.mxu0 %v879_v35 }
 0x45a   :  { %1482 = vmatmul.mubr.f32.gmra.mrb[18].mxu0 %v880_v36  ;;  %1607 = vmatprep.subr.bf16.mxu0 %v1606_v48 }
 0x45b   :  { %1484 = vmatprep.mubr.f32.mxu0 %v881_v38  ;;  %1609 = vmatpush3.bf16.msra.mxu0 %v1606_v48 }
 0x45e   :  { %1485 = vmatmul.mubr.f32.gmra.mrb[20].mxu0 %v882_v37 }
 0x4ea   :  { %v1465_v39 = vpop.f32.mrb[6].mxu0 }
 0x4eb   :  { %v949_v40 = vpop.f32.mrb[7].mxu0 }
 0x4ee   :  { %v1468_v29 = vpop.f32.mrb[8].mxu0 }
 0x4ef   :  { %1032 = vrot.lane.b32.xlu1 %v1468_v29, %s1919_s0  ;;  %v959_v41 = vpop.f32.mrb[9].mxu0 }
 0x4f0   :  { %1030 = vrot.lane.b32.xlu0 %v959_v41, %s1919_s0 }
 0x4f2   :  { %v1471_v49 = vpop.f32.mrb[10].mxu0 }
 0x4f3   :  { %v969_v23 = vpop.f32.mrb[11].mxu0 }
 0x4f4   :  { %1040 = vrot.lane.b32.xlu0 %v1471_v49, %s1908_s10 }
 0x4f6   :  { %v1474_v31 = vpop.f32.mrb[12].mxu0 }
 0x4f7   :  { %1048 = vrot.lane.b32.xlu1 %v1474_v31, %s1920_s1  ;;  %v979_v50 = vpop.f32.mrb[13].mxu0 }
 0x4f8   :  { %1038 = vrot.lane.b32.xlu0 %v969_v23, %s1908_s10 }
 0x4fc   :  { %1046 = vrot.lane.b32.xlu0 %v979_v50, %s1920_s1 }
 0x525   :  { %v1477_v51 = vpop.f32.mrb[14].mxu0 }
 0x526   :  { %1056 = vrot.lane.b32.xlu1 %v1477_v51, %s1921_s21  ;;  %v989_v53 = vpop.f32.mrb[15].mxu0 }
 0x527   :  { %1054 = vrot.lane.b32.xlu0 %v989_v53, %s1921_s21 }
 0x529   :  { %v1480_v55 = vpop.f32.mrb[16].mxu0 }
 0x52a   :  { %1064 = vrot.lane.b32.xlu1 %v1480_v55, %s1922_s22  ;;  %v999_v56 = vpop.f32.mrb[17].mxu0 }
 0x52b   :  { %1062 = vrot.lane.b32.xlu0 %v999_v56, %s1922_s22 }
 0x52d   :  { %v1483_v57 = vpop.f32.mrb[18].mxu0 }
 0x52e   :  { %1072 = vrot.lane.b32.xlu1 %v1483_v57, %s1923_s23  ;;  %v1009_v44 = vpop.f32.mrb[19].mxu0 }
 0x52f   :  { %1070 = vrot.lane.b32.xlu0 %v1009_v44, %s1923_s23 }
 0x531   :  { %v1486_v46 = vpop.f32.mrb[20].mxu0 }
 0x532   :  { %1080 = vrot.lane.b32.xlu1 %v1486_v46, %s1924_s25  ;;  %v1019_v58 = vpop.f32.mrb[21].mxu0 }
 0x533   :  { %1078 = vrot.lane.b32.xlu0 %v1019_v58, %s1924_s25 }
 0x561   :  { %v1033_v54 = vpop.permute.xlu1 %1032 }
 0x562   :  { %v1031_v59 = vpop.permute.xlu0 %1030  ;;  %v1085_v11 = vsel %vm481_vm1, %v1465_v39, %v1033_v54 }
 0x563   :  { %v1084_v8 = vsel %vm481_vm1, %v949_v40, %v1031_v59 }
 0x566   :  { %v1041_v61 = vpop.permute.xlu0 %1040 }
 0x567   :  { %v1088_v17 = vsel %vm1086_vm3, %v1085_v11, %v1041_v61 }
 0x569   :  { %v1049_v0 = vpop.permute.xlu1 %1048 }
 0x56a   :  { %v1039_v52 = vpop.permute.xlu0 %1038  ;;  %v1091_v63 = vsel %vm1089_vm4, %v1088_v17, %v1049_v0 }
 0x56b   :  { %v1087_v13 = vsel %vm1086_vm3, %v1084_v8, %v1039_v52 }
 0x56e   :  { %v1047_v1 = vpop.permute.xlu0 %1046 }
 0x56f   :  { %v1090_v18 = vsel %vm1089_vm4, %v1087_v13, %v1047_v1 }
 0x598   :  { %v1057_v60 = vpop.permute.xlu1 %1056 }
 0x599   :  { %v1055_v2 = vpop.permute.xlu0 %1054  ;;  %v1094_v19 = vsel %vm1092_vm5, %v1091_v63, %v1057_v60 }
 0x59a   :  { %v1093_v62 = vsel %vm1092_vm5, %v1090_v18, %v1055_v2 }
 0x59c   :  { %v1065_v3 = vpop.permute.xlu1 %1064 }
 0x59d   :  { %v1063_v6 = vpop.permute.xlu0 %1062  ;;  %v1097_v9 = vsel %vm1095_vm6, %v1094_v19, %v1065_v3 }
 0x59e   :  { %v1096_v22 = vsel %vm1095_vm6, %v1093_v62, %v1063_v6 }
 0x5a0   :  { %v1073_v10 = vpop.permute.xlu1 %1072 }
 0x5a1   :  { %v1071_v16 = vpop.permute.xlu0 %1070  ;;  %v1100_v25 = vsel %vm1098_vm7, %v1097_v9, %v1073_v10 }
 0x5a2   :  { %v1099_v24 = vsel %vm1098_vm7, %v1096_v22, %v1071_v16 }
 0x5a4   :  { %v1081_v5 = vpop.permute.xlu1 %1080 }
 0x5a5   :  { %v1079_v4 = vpop.permute.xlu0 %1078  ;;  %v1103_v26 = vsel %vm1101_vm8, %v1100_v25, %v1081_v5 }
 0x5a6   :  { %v1102_v7 = vsel %vm1101_vm8, %v1099_v24, %v1079_v4 }
 0x5a7   :  { %1495 = vmatprep.mubr.msk.f32.mxu0 %vm125_vm0, %v1102_v7 }
 0x5a8   :  { %1496 = vmatmul.mubr.msk.f32.vlgmr.msra.gmra.mrb[22].mxu0 %vm125_vm0, %v1103_v26 }
 0x67b   :  { %v1497_v27 = vpop.f32.mrb[22].mxu0 }
 0x67c   :  { %v1186_v28 = vadd.f32 %v1497_v27, %v1251_v15  ;;  %v1180_v30 = vpop.f32.mrb[23].mxu0 }
 0x67d   :  { %v1181_v32 = vadd.f32 %v1251_v15, %v1180_v30 }
 0x67e   :  { %1190 = vst.msk [vmem:[#allocation11 + $0x8] sm:$0xff] %vm125_vm0, %v1186_v28 }
 0x67f   :  { %1189 = vst.msk [vmem:[#allocation11] sm:$0xff] %vm125_vm0, %v1181_v32 }
 0x680   :  { %1886 = shalt.err (!%p1883_p2)
}
 0x681   :  { %s1887_s2 = scalar_lea.hbm %s2316_s6, 256 }
 0x682   :  { %p1888_p3 = scmp.ne.s32.totalorder %s2316_s6, %s1887_s2  ;;  %p1891_p4 = scmp.lt.u32.totalorder %s1887_s2, %s2316_s6 }
 0x684   :  { %p1893_p5 = pnand %p1891_p4, %p1888_p3 }
 0x686   :  { %1896 = shalt.err (!%p1893_p5)
}
 0x687   :  { %1202 = dma.vmem_to_hbm [thread:$0]  %s1197_s30, 256, %s2316_s6, [#allocation4], %s1907_s9, %s1907_s9, %s1908_s10  }
 0x688   :  { %1903 = dma.done.wait [#allocation4], 256  }
 0x689   :  { %1904 = vsyncadd [#allocation4], 4294967040 }
 0x68a   :  { %1206 = vsyncpa [#allocation3], 1 }
 0x68b   :  { %1207 = vsyncpa [#allocation6], 1 }
 0x68c   :  { %1208 = vsyncpa [#allocation9], 1 }
 0x68d   :  { %1209 = vsyncpa [#allocation4], 1 }

</bundles_post_ra>
